<compile_context>
chip_gen: v7x
topology: tpu7x:2x2x1
jax: 0.10.0
libtpu: 0.0.40
codegen_flags: <defaults>
</compile_context>

<pallas_src>
import numpy as np

import jax
import jax.numpy as jnp
from jax import lax
from jax.experimental import pallas as pl
from jax.experimental.pallas import tpu as pltpu


def basic_block_g_kernel(x_ref, m_ref, w1b_ref, w2b_ref, wskb_ref, bias_ref, o_ref):
    # x_ref   : (H+4, (W+4)*Cin)   zero-padded input, lane-dense, batch squeezed
    # m_ref   : (H+2, (W+2)*Cout)  conv1-slab halo mask (1 inside, 0 on border)
    # w1b_ref : (3, (W+4)*Cin, (W+2)*Cout)  conv1 banded weights, one per row tap
    # w2b_ref : (3, (W+2)*Cout, W*Cout)     conv2 banded weights, one per row tap
    # wskb_ref: ((W+4)*Cin, W*Cout)         skip 1x1 banded weights
    # bias_ref: (1, W*Cout)                 skip bias tiled over width
    # o_ref   : (H, W*Cout)                 lane-dense output
    H = o_ref.shape[0]
    Hs = H + 2                       # conv1 slab rows (incl. conv2's zero-pad halo)

    x = x_ref[...]                   # un-relu'd padded input (needed for the skip)
    xr = jnp.maximum(x, 0.0)         # relu(x); padding zeros stay zero

    # ---- conv1: 3 banded MXU dots (one per row tap), all lane-dense ----
    slab = jnp.dot(xr[0:Hs, :], w1b_ref[0], preferred_element_type=jnp.float32)
    for ky in range(1, 3):
        slab = slab + jnp.dot(xr[ky:ky + Hs, :], w1b_ref[ky],
                              preferred_element_type=jnp.float32)
    # relu, then zero the 1-px halo (== conv2's SAME zero padding) with the
    # precomputed mask -- no VMEM scratch, no per-step iota/compare.
    slab = jnp.maximum(slab, 0.0) * m_ref[...]

    # ---- skip (1x1 conv + bias on the ORIGINAL x) + conv2 (3 banded dots) ----
    out = jnp.dot(x[2:2 + H, :], wskb_ref[...],
                  preferred_element_type=jnp.float32) + bias_ref[...]
    for ky in range(3):
        out = out + jnp.dot(slab[ky:ky + H, :], w2b_ref[ky],
                            preferred_element_type=jnp.float32)

    o_ref[...] = out                 # lane-dense store (last dim = W*Cout = 128)


def _banded_weights(w1_hwio, w2_hwio, ws, bs, H, W):
    """Fold the 3x3 column taps of both convs (and the 1x1 skip) into banded
    weight matrices so the kernel is pure lane-dense row matmuls (hoisted)."""
    Cin, Cout = ws.shape
    Wp4, Ws = W + 4, W + 2

    # conv1: B1[ky][j*Cin+ci, xx*Cout+co] = w1[ky, j-xx, ci, co] if 0<=j-xx<=2
    d1 = np.arange(Wp4)[:, None] - np.arange(Ws)[None, :]
    sel1 = ((d1 >= 0) & (d1 <= 2)).astype(np.float32)
    g1 = w1_hwio[:, np.clip(d1, 0, 2), :, :]                 # (3, Wp4, Ws, Cin, Cout)
    w1b = (jnp.transpose(g1, (0, 1, 3, 2, 4))
           * sel1[None, :, None, :, None]).reshape(3, Wp4 * Cin, Ws * Cout)

    # conv2: B2[ky][j*Cout+c, x*Cout+co] = w2[ky, j-x, c, co] if 0<=j-x<=2
    d2 = np.arange(Ws)[:, None] - np.arange(W)[None, :]
    sel2 = ((d2 >= 0) & (d2 <= 2)).astype(np.float32)
    g2 = w2_hwio[:, np.clip(d2, 0, 2), :, :]                 # (3, Ws, W, Cout, Cout)
    w2b = (jnp.transpose(g2, (0, 1, 3, 2, 4))
           * sel2[None, :, None, :, None]).reshape(3, Ws * Cout, W * Cout)

    # skip 1x1: block-diagonal at column offset 2 (the pad-by-2 frame)
    sels = (np.arange(Wp4)[:, None] == np.arange(W)[None, :] + 2).astype(np.float32)
    wskb = (ws[None, :, None, :] * sels[:, None, :, None]).reshape(Wp4 * Cin, W * Cout)

    bias = jnp.tile(bs, W).reshape(1, W * Cout)

    mask = np.zeros((H + 2, Ws, Cout), np.float32)
    mask[1:H + 1, 1:W + 1, :] = 1.0
    mask = jnp.asarray(mask.reshape(H + 2, Ws * Cout))
    return w1b, w2b, wskb, bias, mask


def basic_block_g_nhwc(x_nhwc, w1_hwio, w2_hwio, ws, bs):
    """x_nhwc: (N, H, W, Cin) float32.  Returns (N, H, W, Cout)."""
    N, H, W, Cin = x_nhwc.shape
    Cout = ws.shape[-1]
    Wp4, Ws = W + 4, W + 2

    # Zero-pad ONCE in the wrapper (2 rows/cols each side covers conv1 evaluated
    # on the (H+2, W+2) slab); relu(0)=0 so pre-pad + in-kernel relu matches the
    # module's pad-after-relu.  Then present it lane-dense.
    x_dense = jnp.pad(x_nhwc, ((0, 0), (2, 2), (2, 2), (0, 0))).reshape(
        N, H + 4, Wp4 * Cin)

    w1b, w2b, wskb, bias, mask = _banded_weights(w1_hwio, w2_hwio, ws, bs, H, W)

    flops = 2 * N * (3 * (H + 2) * (Wp4 * Cin) * (Ws * Cout)
                     + 3 * H * (Ws * Cout) * (W * Cout)
                     + H * (Wp4 * Cin) * (W * Cout))
    bytes_accessed = 4 * (N * (H + 4) * Wp4 * Cin + N * H * W * Cout
                          + int(w1b.size) + int(w2b.size) + int(wskb.size)
                          + int(bias.size) + int(mask.size))
    # Size the VMEM limit from the actual (double-buffered) blocks, not a flat cap.
    buf_bytes = 4 * 2 * ((H + 4) * Wp4 * Cin + H * W * Cout
                         + int(w1b.size) + int(w2b.size) + int(wskb.size)
                         + int(bias.size) + int(mask.size))
    vmem_limit = int(max(2 * buf_bytes, 4 << 20))     # well under v7x's 64 MiB

    # TODO(synk): on v6e/v7x, cast x_dense / banded weights to bf16 for the MXU
    # dots at production sizes (kept f32 here to match the reference exactly).
    out = pl.pallas_call(
        basic_block_g_kernel,
        out_shape=jax.ShapeDtypeStruct((N, H, W * Cout), jnp.float32),
        grid=(N,),
        in_specs=[
            pl.BlockSpec((None, H + 4, Wp4 * Cin), lambda n: (n, 0, 0)),
            pl.BlockSpec((H + 2, Ws * Cout), lambda n: (0, 0)),
            pl.BlockSpec((3, Wp4 * Cin, Ws * Cout), lambda n: (0, 0, 0)),
            pl.BlockSpec((3, Ws * Cout, W * Cout), lambda n: (0, 0, 0)),
            pl.BlockSpec((Wp4 * Cin, W * Cout), lambda n: (0, 0)),
            pl.BlockSpec((1, W * Cout), lambda n: (0, 0)),
        ],
        out_specs=pl.BlockSpec((None, H, W * Cout), lambda n: (n, 0, 0)),
        compiler_params=pltpu.CompilerParams(
            dimension_semantics=("parallel",),   # N=2 -> one image per v7x TensorCore
            vmem_limit_bytes=vmem_limit),
        cost_estimate=pl.CostEstimate(flops=flops, transcendentals=0,
                                      bytes_accessed=bytes_accessed),
    )(x_dense, mask, w1b, w2b, wskb, bias)

    return out.reshape(N, H, W, Cout)


def basic_block_g(x_nchw, w1_hwio, w2_hwio, ws, bs):
    """PyTorch-layout entry point: (N, Cin, H, W) -> (N, Cout, H, W).

    NOTE: in a JAX model prefer basic_block_g_nhwc to avoid the two full-tensor
    HBM transposes below (kept only for NCHW interface parity with the module).
    """
    x_nhwc = jnp.transpose(x_nchw, (0, 2, 3, 1))
    out_nhwc = basic_block_g_nhwc(x_nhwc, w1_hwio, w2_hwio, ws, bs)
    return jnp.transpose(out_nhwc, (0, 3, 1, 2))


def reference_forward(x_nchw, w1_hwio, w2_hwio, ws, bs):
    """Pure-JAX reference (NHWC convs), returns NCHW."""
    x = jnp.transpose(x_nchw, (0, 2, 3, 1))
    dn = ('NHWC', 'HWIO', 'NHWC')
    out = jax.nn.relu(x)
    out = lax.conv_general_dilated(out, w1_hwio, (1, 1), 'SAME',
                                   dimension_numbers=dn)
    out = jax.nn.relu(out)
    out = lax.conv_general_dilated(out, w2_hwio, (1, 1), 'SAME',
                                   dimension_numbers=dn)
    skip = jnp.einsum('nhwc,cd->nhwd', x, ws) + bs
    return jnp.transpose(out + skip, (0, 3, 1, 2))


if __name__ == "__main__":
    # Small shapes consistent with the module: N=2, inplanes=4, planes=8, 16x16.
    N, Cin, Cout, H, W = 2, 4, 8, 16, 16

    key = jax.random.PRNGKey(0)
    kx, k1, k2, k3, k4 = jax.random.split(key, 5)

    x = jax.random.normal(kx, (N, Cin, H, W), dtype=jnp.float32)             # NCHW input
    w1 = jax.random.normal(k1, (3, 3, Cin, Cout), dtype=jnp.float32) * 0.1   # conv1 (HWIO)
    w2 = jax.random.normal(k2, (3, 3, Cout, Cout), dtype=jnp.float32) * 0.1  # conv2 (HWIO)
    ws = jax.random.normal(k3, (Cin, Cout), dtype=jnp.float32) * 0.1         # skip 1x1 weight
    bs = jax.random.normal(k4, (Cout,), dtype=jnp.float32) * 0.1             # skip bias

    out = basic_block_g(x, w1, w2, ws, bs)
    out = jax.block_until_ready(out)

    ref = reference_forward(x, w1, w2, ws, bs)
    assert out.shape == (N, Cout, H, W)
    assert jnp.allclose(out, ref, atol=1e-3, rtol=1e-3), "mismatch vs JAX reference"

    print("KERNEL_OK")
</pallas_src>

<mosaic_0001>
module attributes {stable_mosaic.version = 11 : i64} {
  func.func @basic_block_g_kernel(%arg0: i32, %arg1: memref<1x20x80xf32, #tpu.memory_space<vmem>>, %arg2: memref<18x144xf32, #tpu.memory_space<vmem>>, %arg3: memref<3x80x144xf32, #tpu.memory_space<vmem>>, %arg4: memref<3x144x128xf32, #tpu.memory_space<vmem>>, %arg5: memref<80x128xf32, #tpu.memory_space<vmem>>, %arg6: memref<1x128xf32, #tpu.memory_space<vmem>>, %arg7: memref<1x16x128xf32, #tpu.memory_space<vmem>>) attributes {dimension_semantics = [#tpu.dimension_semantics<parallel>], iteration_bounds = array<i64: 2>, scalar_prefetch = 0 : i64, scratch_operands = 0 : i64, tpu.core_type = #tpu.core_type<tc>, window_params = [{transform_indices = @transform_0, window_bounds = array<i64: 1, 20, 80>}, {pipeline_mode = #tpu.pipeline_mode<synchronous>, transform_indices = @transform_1, window_bounds = array<i64: 18, 144>}, {pipeline_mode = #tpu.pipeline_mode<synchronous>, transform_indices = @transform_2, window_bounds = array<i64: 3, 80, 144>}, {pipeline_mode = #tpu.pipeline_mode<synchronous>, transform_indices = @transform_3, window_bounds = array<i64: 3, 144, 128>}, {pipeline_mode = #tpu.pipeline_mode<synchronous>, transform_indices = @transform_4, window_bounds = array<i64: 80, 128>}, {pipeline_mode = #tpu.pipeline_mode<synchronous>, transform_indices = @transform_5, window_bounds = array<i64: 1, 128>}, {transform_indices = @transform_6, window_bounds = array<i64: 1, 16, 128>}]} {
    %c0 = arith.constant 0 : index
    %c0_0 = arith.constant 0 : index
    %c0_1 = arith.constant 0 : index
    %0 = vector.load %arg1[%c0, %c0_0, %c0_1] : memref<1x20x80xf32, #tpu.memory_space<vmem>>, vector<1x20x80xf32>
    %1 = vector.shape_cast %0 : vector<1x20x80xf32> to vector<20x80xf32>
    %cst = arith.constant 0.000000e+00 : f32
    %2 = vector.broadcast %cst : f32 to vector<20x80xf32>
    %3 = arith.maximumf %1, %2 : vector<20x80xf32>
    %4 = vector.extract_strided_slice %3 {offsets = [0, 0], sizes = [18, 80], strides = [1, 1]} : vector<20x80xf32> to vector<18x80xf32>
    %c0_2 = arith.constant 0 : index
    %c0_3 = arith.constant 0 : index
    %c0_4 = arith.constant 0 : index
    %5 = vector.load %arg3[%c0_2, %c0_3, %c0_4] : memref<3x80x144xf32, #tpu.memory_space<vmem>>, vector<1x80x144xf32>
    %6 = vector.shape_cast %5 : vector<1x80x144xf32> to vector<80x144xf32>
    %cst_5 = arith.constant dense<0.000000e+00> : vector<18x144xf32>
    %7 = tpu.matmul %4, %6, %cst_5 {dimension_numbers = #tpu.dot_dimension_numbers<[1], [0], [0], [1], [0, 0, 1, 1], [], []>} : vector<18x80xf32>, vector<80x144xf32>, vector<18x144xf32> -> vector<18x144xf32>
    %8 = vector.extract_strided_slice %3 {offsets = [1, 0], sizes = [18, 80], strides = [1, 1]} : vector<20x80xf32> to vector<18x80xf32>
    %c1 = arith.constant 1 : index
    %c0_6 = arith.constant 0 : index
    %c0_7 = arith.constant 0 : index
    %9 = vector.load %arg3[%c1, %c0_6, %c0_7] : memref<3x80x144xf32, #tpu.memory_space<vmem>>, vector<1x80x144xf32>
    %10 = vector.shape_cast %9 : vector<1x80x144xf32> to vector<80x144xf32>
    %cst_8 = arith.constant dense<0.000000e+00> : vector<18x144xf32>
    %11 = tpu.matmul %8, %10, %cst_8 {dimension_numbers = #tpu.dot_dimension_numbers<[1], [0], [0], [1], [0, 0, 1, 1], [], []>} : vector<18x80xf32>, vector<80x144xf32>, vector<18x144xf32> -> vector<18x144xf32>
    %12 = arith.addf %7, %11 : vector<18x144xf32>
    %13 = vector.extract_strided_slice %3 {offsets = [2, 0], sizes = [18, 80], strides = [1, 1]} : vector<20x80xf32> to vector<18x80xf32>
    %c2 = arith.constant 2 : index
    %c0_9 = arith.constant 0 : index
    %c0_10 = arith.constant 0 : index
    %14 = vector.load %arg3[%c2, %c0_9, %c0_10] : memref<3x80x144xf32, #tpu.memory_space<vmem>>, vector<1x80x144xf32>
    %15 = vector.shape_cast %14 : vector<1x80x144xf32> to vector<80x144xf32>
    %cst_11 = arith.constant dense<0.000000e+00> : vector<18x144xf32>
    %16 = tpu.matmul %13, %15, %cst_11 {dimension_numbers = #tpu.dot_dimension_numbers<[1], [0], [0], [1], [0, 0, 1, 1], [], []>} : vector<18x80xf32>, vector<80x144xf32>, vector<18x144xf32> -> vector<18x144xf32>
    %17 = arith.addf %12, %16 : vector<18x144xf32>
    %cst_12 = arith.constant 0.000000e+00 : f32
    %18 = vector.broadcast %cst_12 : f32 to vector<18x144xf32>
    %19 = arith.maximumf %17, %18 : vector<18x144xf32>
    %c0_13 = arith.constant 0 : index
    %c0_14 = arith.constant 0 : index
    %20 = vector.load %arg2[%c0_13, %c0_14] : memref<18x144xf32, #tpu.memory_space<vmem>>, vector<18x144xf32>
    %21 = arith.mulf %19, %20 : vector<18x144xf32>
    %22 = vector.extract_strided_slice %1 {offsets = [2, 0], sizes = [16, 80], strides = [1, 1]} : vector<20x80xf32> to vector<16x80xf32>
    %c0_15 = arith.constant 0 : index
    %c0_16 = arith.constant 0 : index
    %23 = vector.load %arg5[%c0_15, %c0_16] : memref<80x128xf32, #tpu.memory_space<vmem>>, vector<80x128xf32>
    %cst_17 = arith.constant dense<0.000000e+00> : vector<16x128xf32>
    %24 = tpu.matmul %22, %23, %cst_17 {dimension_numbers = #tpu.dot_dimension_numbers<[1], [0], [0], [1], [0, 0, 1, 1], [], []>} : vector<16x80xf32>, vector<80x128xf32>, vector<16x128xf32> -> vector<16x128xf32>
    %c0_18 = arith.constant 0 : index
    %c0_19 = arith.constant 0 : index
    %25 = vector.load %arg6[%c0_18, %c0_19] : memref<1x128xf32, #tpu.memory_space<vmem>>, vector<1x128xf32>
    %26 = vector.broadcast %25 : vector<1x128xf32> to vector<16x128xf32>
    %27 = arith.addf %24, %26 : vector<16x128xf32>
    %28 = vector.extract_strided_slice %21 {offsets = [0, 0], sizes = [16, 144], strides = [1, 1]} : vector<18x144xf32> to vector<16x144xf32>
    %c0_20 = arith.constant 0 : index
    %c0_21 = arith.constant 0 : index
    %c0_22 = arith.constant 0 : index
    %29 = vector.load %arg4[%c0_20, %c0_21, %c0_22] : memref<3x144x128xf32, #tpu.memory_space<vmem>>, vector<1x144x128xf32>
    %30 = vector.shape_cast %29 : vector<1x144x128xf32> to vector<144x128xf32>
    %cst_23 = arith.constant dense<0.000000e+00> : vector<16x128xf32>
    %31 = tpu.matmul %28, %30, %cst_23 {dimension_numbers = #tpu.dot_dimension_numbers<[1], [0], [0], [1], [0, 0, 1, 1], [], []>} : vector<16x144xf32>, vector<144x128xf32>, vector<16x128xf32> -> vector<16x128xf32>
    %32 = arith.addf %27, %31 : vector<16x128xf32>
    %33 = vector.extract_strided_slice %21 {offsets = [1, 0], sizes = [16, 144], strides = [1, 1]} : vector<18x144xf32> to vector<16x144xf32>
    %c1_24 = arith.constant 1 : index
    %c0_25 = arith.constant 0 : index
    %c0_26 = arith.constant 0 : index
    %34 = vector.load %arg4[%c1_24, %c0_25, %c0_26] : memref<3x144x128xf32, #tpu.memory_space<vmem>>, vector<1x144x128xf32>
    %35 = vector.shape_cast %34 : vector<1x144x128xf32> to vector<144x128xf32>
    %cst_27 = arith.constant dense<0.000000e+00> : vector<16x128xf32>
    %36 = tpu.matmul %33, %35, %cst_27 {dimension_numbers = #tpu.dot_dimension_numbers<[1], [0], [0], [1], [0, 0, 1, 1], [], []>} : vector<16x144xf32>, vector<144x128xf32>, vector<16x128xf32> -> vector<16x128xf32>
    %37 = arith.addf %32, %36 : vector<16x128xf32>
    %38 = vector.extract_strided_slice %21 {offsets = [2, 0], sizes = [16, 144], strides = [1, 1]} : vector<18x144xf32> to vector<16x144xf32>
    %c2_28 = arith.constant 2 : index
    %c0_29 = arith.constant 0 : index
    %c0_30 = arith.constant 0 : index
    %39 = vector.load %arg4[%c2_28, %c0_29, %c0_30] : memref<3x144x128xf32, #tpu.memory_space<vmem>>, vector<1x144x128xf32>
    %40 = vector.shape_cast %39 : vector<1x144x128xf32> to vector<144x128xf32>
    %cst_31 = arith.constant dense<0.000000e+00> : vector<16x128xf32>
    %41 = tpu.matmul %38, %40, %cst_31 {dimension_numbers = #tpu.dot_dimension_numbers<[1], [0], [0], [1], [0, 0, 1, 1], [], []>} : vector<16x144xf32>, vector<144x128xf32>, vector<16x128xf32> -> vector<16x128xf32>
    %42 = arith.addf %37, %41 : vector<16x128xf32>
    %c0_32 = arith.constant 0 : index
    %c0_33 = arith.constant 0 : index
    %c0_34 = arith.constant 0 : index
    %43 = vector.load %arg7[%c0_32, %c0_33, %c0_34] : memref<1x16x128xf32, #tpu.memory_space<vmem>>, vector<1x16x128xf32>
    %44 = vector.shape_cast %43 : vector<1x16x128xf32> to vector<16x128xf32>
    %45 = vector.shape_cast %42 : vector<16x128xf32> to vector<1x16x128xf32>
    tpu.vector_store %arg7[%c0_32, %c0_33, %c0_34], %45 {strides = array<i32>} : memref<1x16x128xf32, #tpu.memory_space<vmem>>, vector<1x16x128xf32>,
    return
  }
  func.func @transform_0(%arg0: i32) -> (i32, i32, i32) {
    %c0_i32 = arith.constant 0 : i32
    %c0_i32_0 = arith.constant 0 : i32
    %c0_i32_1 = arith.constant 0 : i32
    return %arg0, %c0_i32, %c0_i32_0 : i32, i32, i32
  }
  func.func @transform_1(%arg0: i32) -> (i32, i32) {
    %c0_i32 = arith.constant 0 : i32
    %c0_i32_0 = arith.constant 0 : i32
    %c0_i32_1 = arith.constant 0 : i32
    return %c0_i32, %c0_i32_0 : i32, i32
  }
  func.func @transform_2(%arg0: i32) -> (i32, i32, i32) {
    %c0_i32 = arith.constant 0 : i32
    %c0_i32_0 = arith.constant 0 : i32
    %c0_i32_1 = arith.constant 0 : i32
    %c0_i32_2 = arith.constant 0 : i32
    return %c0_i32, %c0_i32_0, %c0_i32_1 : i32, i32, i32
  }
  func.func @transform_3(%arg0: i32) -> (i32, i32, i32) {
    %c0_i32 = arith.constant 0 : i32
    %c0_i32_0 = arith.constant 0 : i32
    %c0_i32_1 = arith.constant 0 : i32
    %c0_i32_2 = arith.constant 0 : i32
    return %c0_i32, %c0_i32_0, %c0_i32_1 : i32, i32, i32
  }
  func.func @transform_4(%arg0: i32) -> (i32, i32) {
    %c0_i32 = arith.constant 0 : i32
    %c0_i32_0 = arith.constant 0 : i32
    %c0_i32_1 = arith.constant 0 : i32
    return %c0_i32, %c0_i32_0 : i32, i32
  }
  func.func @transform_5(%arg0: i32) -> (i32, i32) {
    %c0_i32 = arith.constant 0 : i32
    %c0_i32_0 = arith.constant 0 : i32
    %c0_i32_1 = arith.constant 0 : i32
    return %c0_i32, %c0_i32_0 : i32, i32
  }
  func.func @transform_6(%arg0: i32) -> (i32, i32, i32) {
    %c0_i32 = arith.constant 0 : i32
    %c0_i32_0 = arith.constant 0 : i32
    %c0_i32_1 = arith.constant 0 : i32
    return %arg0, %c0_i32, %c0_i32_0 : i32, i32, i32
  }
}

</mosaic_0001>

<bundles_post_ra>
// kernel: tpu_custom_call.1
= control target key start
LH: loop header
LB: loop body
LE: loop exit
PB: predicated region body
PF: predicated region fallthrough
CT: control target
= control target key end

     0   :  { %11 = vsyncpa [#allocation3], 0  ;;  %s2198_s0 = inlined_call_operand.vmem [shape: f32[2,20,80], index: 0, kind: input, shape index: {}]   ;;  %s2199_s1 = inlined_call_operand.vmem [shape: f32[18,144], index: 1, kind: input, shape index: {}]   ;;  %s2200_s2 = inlined_call_operand.vmem [shape: f32[3,80,144], index: 2, kind: input, shape index: {}]   ;;  %s2201_s3 = inlined_call_operand.vmem [shape: f32[3,144,128], index: 3, kind: input, shape index: {}]   ;;  %s2202_s4 = inlined_call_operand.vmem [shape: f32[80,128], index: 4, kind: input, shape index: {}]   ;;  %s2203_s5 = inlined_call_operand.vmem [shape: f32[1,128], index: 5, kind: input, shape index: {}]   ;;  %s2204_s6 = inlined_call_operand.hbm [shape: f32[2,16,128], index: 6, kind: output, shape index: {}]  }
   0x1   :  { %13 = vsyncpa [#allocation3 + $0x1], 0  ;;  %s1602_s21 = smov 0   ;;  %s1604_s22 = smov 0  }
   0x2   :  { %s1606_s23 = smov 0   ;;  %s1608_s24 = smov 0  }
   0x3 LB: > { %s1623_s25 = sadd.s32 4294967295, %s1560_s24   ;;  %s1137_s26 = sadd.s32 4294967294, %s1560_s24   ;;  %s1560_s24 = sphi %s1608_s24, %s2210_s24   ;;  %s1556_s23 = sphi %s1606_s23, %s2209_s23   ;;  %s1552_s22 = sphi %s1604_s22, %s2208_s22   ;;  %s1548_s21 = sphi %s1602_s21, %s2207_s21  }
   0x4   : > { %s1627_s27 = sadd.s32 1, %s1560_s24   ;;  %s157_s28 = sadd.s32 1, %s1556_s23 }
   0x5   : > { %s154_s29 = ssub.s32 %s1560_s24, %s1627_s27  ;;  %p167_p0 = scmp.ne.s32.totalorder %s1556_s23, %s1552_s22 }
   0x6   : > { %p155_p1 = scmp.eq.s32.totalorder %s154_s29, 0  ;;  %p168_p2 = scmp.eq.s32.totalorder %s1623_s25, 1 }
   0x7   : > { %p173_p3 = scmp.ne.s32.totalorder %s1552_s22, %s1548_s21  ;;  %p174_p4 = scmp.eq.s32.totalorder %s1137_s26, 1 }
   0x8   : > { %s1638_s30 = scalar_select %p155_p1, %s1556_s23, %s157_s28  }
   0x9   : > { %p1640_p5 = por %p168_p2, %p167_p0  ;;  %p1644_p6 = por %p174_p4, %p173_p3 }
   0xa   : > { %p1140_p7 = scmp.ge.s32.totalorder %s1560_s24, 1  ;;  %p215_p8 = scmp.lt.s32.totalorder %s1560_s24, 3 }
   0xc   : > { %p216_p9 = pnand %p1140_p7, %p215_p8 }
   0xd   : > { %v1144_v0 = vld [vmem:[%s2200_s2 + $0xa8] sm:$0xff] (!%p216_p9)  ;;  %v1146_v1 = vld [vmem:[%s2200_s2 + $0xb8] sm:$0xff] (!%p216_p9)  ;;  %v1143_v2 = vld [vmem:[%s2200_s2 + $0xa0] sm:$0xff] (!%p216_p9)  ;;  %p245_p10 = scmp.lt.s32.totalorder (!%p216_p9), %s1623_s25, 1  ;;  %v1562_v7 = vmov (!%p216_p9), 0.0   ;;  %vm506_vm0 = vcmask (!%p216_p9), 1045504  }
   0xe   : > { %219 = sbr.rel (%p216_p9) target bundleno = 570 (0x23a), region = 44  ;;  %v1278_v3 = vpack.c.bf16 (!%p216_p9), %v1146_v1, %v1144_v0  ;;  %v1145_v4 = vld [vmem:[%s2200_s2 + $0xb0] sm:$0xff] (!%p216_p9)  ;;  %v1148_v5 = vld [vmem:[%s2200_s2 + $0xc8] sm:$0xff] (!%p216_p9)  ;;  %v1150_v6 = vld [vmem:[%s2200_s2 + $0xd8] sm:$0xff] (!%p216_p9)  ;;  %377 = vmatprep.mubr.f32.mxu0 (!%p216_p9), %v1562_v7  ;;  %vm306_vm1 = vcmask (!%p216_p9), 654336   ;;  %vm300_vm2 = vcmask (!%p216_p9), 1046528  }
   0xf   : > { %v1280_v8 = vpack.c.bf16 (!%p216_p9), %v1145_v4, %v1143_v2  ;;  %v1282_v9 = vpack.c.bf16 (!%p216_p9), %v1150_v6, %v1148_v5  ;;  %v1147_v10 = vld [vmem:[%s2200_s2 + $0xc0] sm:$0xff] (!%p216_p9)  ;;  %v1149_v11 = vld [vmem:[%s2200_s2 + $0xd0] sm:$0xff] (!%p216_p9)  ;;  %v1152_v12 = vld [vmem:[%s2200_s2 + $0xe8] sm:$0xff] (!%p216_p9)  ;;  %vm747_vm3 = vcmask (!%p216_p9), 130048   ;;  %s242_s26 = sand.u32 (!%p216_p9), 1, %s1552_s22   ;;  %s1242_s10 = sshll.u32 (!%p216_p9), %s1623_s25, 8 }
  0x10   : > { %1279 = vmatprep.subr.bf16.mxu0 (!%p216_p9), %v1278_v3  ;;  %v1154_v13 = vld [vmem:[%s2200_s2 + $0xf8] sm:$0xff] (!%p216_p9)  ;;  %v1284_v14 = vpack.c.bf16 (!%p216_p9), %v1149_v11, %v1147_v10  ;;  %v1151_v16 = vld [vmem:[%s2200_s2 + $0xe0] sm:$0xff] (!%p216_p9)  ;;  %v1153_v17 = vld [vmem:[%s2200_s2 + $0xf0] sm:$0xff] (!%p216_p9)  ;;  %s1141_s28 = sshll.u32 (!%p216_p9), %s242_s26, 4  ;;  %s2157_s14 = scalar_lea.sflag (!%p216_p9), [#allocation3], %s242_s26 }
  0x11   : > { %1281 = vmatpush1.bf16.msra.mxu0 (!%p216_p9), %v1280_v8  ;;  %v1286_v15 = vpack.c.bf16 (!%p216_p9), %v1154_v13, %v1152_v12  ;;  %v1156_v18 = vld [vmem:[%s2200_s2 + $0x108] sm:$0xff] (!%p216_p9)  ;;  %v1158_v19 = vld [vmem:[%s2200_s2 + $0x118] sm:$0xff] (!%p216_p9)  ;;  %v1288_v21 = vpack.c.bf16 (!%p216_p9), %v1153_v17, %v1151_v16  ;;  %v1155_v25 = vld [vmem:[%s2200_s2 + $0x100] sm:$0xff] (!%p216_p9)  ;;  %s244_s29 = scalar_lea.vmem (!%p216_p9), [#allocation2], %s1141_s28 }
  0x12   : > { %1283 = vmatprep.subr.bf16.mxu0 (!%p216_p9), %v1282_v9  ;;  %v1290_v24 = vpack.c.bf16 (!%p216_p9), %v1158_v19, %v1156_v18  ;;  %v1157_v26 = vld [vmem:[%s2200_s2 + $0x110] sm:$0xff] (!%p216_p9)  ;;  %v1160_v28 = vld [vmem:[%s2200_s2 + $0x128] sm:$0xff] (!%p216_p9)  ;;  %v1162_v29 = vld [vmem:[%s2200_s2 + $0x138] sm:$0xff] (!%p216_p9)  ;;  %s1075_s9 = sshll.u32 (!%p216_p9), %s244_s29, 4  ;;  %s2150_s9 = int_to_ptr.vmem [resolvable:$true] %s1075_s9 }
  0x13   : > { %v1292_v31 = vpack.c.bf16 (!%p216_p9), %v1157_v26, %v1155_v25  ;;  %v1294_v34 = vpack.c.bf16 (!%p216_p9), %v1162_v29, %v1160_v28  ;;  %v1159_v35 = vld [vmem:[%s2200_s2 + $0x120] sm:$0xff] (!%p216_p9)  ;;  %v1161_v36 = vld [vmem:[%s2200_s2 + $0x130] sm:$0xff] (!%p216_p9)  ;;  %v257_v38 = vld [vmem:[%s2200_s2 + $0x8] sm:$0xff] (!%p216_p9)  ;;  %s1498_s16 = scalar_lea.vmem (!%p216_p9), %s2150_s9, 256 }
  0x14   : > { %v259_v39 = vld [vmem:[%s2200_s2 + $0x18] sm:$0xff] (!%p216_p9)  ;;  %v1296_v40 = vpack.c.bf16 (!%p216_p9), %v1161_v36, %v1159_v35  ;;  %v256_v45 = vld [vmem:[%s2200_s2] sm:$0xff] (!%p216_p9)  ;;  %v258_v46 = vld [vmem:[%s2200_s2 + $0x10] sm:$0xff] (!%p216_p9)  ;;  %p1499_p11 = scmp.ne.s32.totalorder (!%p216_p9), %s2150_s9, %s1498_s16 }
  0x15   : > { %s246_s12 = scalar_select %p245_p10, %s1623_s25, 1  ;;  %1285 = vmatpush1.bf16.msra.mxu0 %v1284_v14  ;;  %v1298_v44 = vpack.c.bf16 %v259_v39, %v257_v38  ;;  %v261_v47 = vld [vmem:[%s2200_s2 + $0x28] sm:$0xff]  ;;  %v263_v48 = vld [vmem:[%s2200_s2 + $0x38] sm:$0xff]  ;;  %v1300_v50 = vpack.c.bf16 %v258_v46, %v256_v45  ;;  %v260_v51 = vld [vmem:[%s2200_s2 + $0x20] sm:$0xff] }
  0x16   : > { %1287 = vmatprep.subr.bf16.mxu0 %v1286_v15  ;;  %v262_v52 = vld [vmem:[%s2200_s2 + $0x30] sm:$0xff]  ;;  %v1302_v54 = vpack.c.bf16 %v263_v48, %v261_v47  ;;  %v625_v55 = vld [vmem:[%s2202_s4] sm:$0xff]  ;;  %v626_v56 = vld [vmem:[%s2202_s4 + $0x8] sm:$0xff]  ;;  %p1500_p12 = pnand %p1499_p11, %p1640_p5  ;;  %s1564_s25 = smov [#allocation2]  }
  0x17   : > { %s1454_s15 = smul.u32 24, %s246_s12  ;;  %v627_v57 = vld [vmem:[%s2202_s4 + $0x10] sm:$0xff]  ;;  %v265_v58 = vld [vmem:[%s2200_s2 + $0x48] sm:$0xff]  ;;  %v267_v59 = vld [vmem:[%s2200_s2 + $0x58] sm:$0xff]  ;;  %v1338_v60 = vpack.c.bf16 %v626_v56, %v625_v55  ;;  %v1304_v63 = vpack.c.bf16 %v262_v52, %v260_v51  ;;  %s1502_s17 = sshll.u32 %s1564_s25, 4  ;;  %s1503_s17 = int_to_ptr.vmem [resolvable:$false] %s1502_s17 }
  0x18   : > { %v628_v61 = vld [vmem:[%s2202_s4 + $0x18] sm:$0xff]  ;;  %v629_v1 = vld [vmem:[%s2202_s4 + $0x20] sm:$0xff]  ;;  %v630_v2 = vld [vmem:[%s2202_s4 + $0x28] sm:$0xff]  ;;  %v1306_v3 = vpack.c.bf16 %v267_v59, %v265_v58  ;;  %p1501_p13 = pneg %p1500_p12  ;;  %p1505_p0 = scmp.lt.s32.totalorder %s2150_s9, %s1503_s17 }
  0x19   : > { %s249_s11 = scalar_lea.vmem %s2198_s0, %s1454_s15  ;;  %1289 = vmatpush1.bf16.msra.mxu0 %v1288_v21  ;;  %v1342_v62 = vpack.c.bf16 %v628_v61, %v627_v57  ;;  %v264_v4 = vld [vmem:[%s2200_s2 + $0x40] sm:$0xff]  ;;  %v266_v5 = vld [vmem:[%s2200_s2 + $0x50] sm:$0xff]  ;;  %1339 = vmatprep.subr.bf16.mxu1 %v1338_v60  ;;  %v269_v6 = vld [vmem:[%s2200_s2 + $0x68] sm:$0xff]  ;;  %v1346_v9 = vpack.c.bf16 %v630_v2, %v629_v1  ;;  %s1504_s15 = scalar_lea.vmem %s1503_s17, 512 }
  0x1a   : > { %v250_v20 = vld [vmem:[%s249_s11] sm:$0xff]  ;;  %v1698_v22 = vld [vmem:[%s249_s11 + $0x8] sm:$0xff]  ;;  %1291 = vmatprep.subr.bf16.mxu0 %v1290_v24  ;;  %v1728_v37 = vld [vmem:[%s249_s11 + $0x10] sm:$0xf]  ;;  %1341 = vmatpush3.bf16.msra.mxu1 %v1338_v60  ;;  %v1308_v10 = vpack.c.bf16 %v266_v5, %v264_v4  ;;  %s2155_s11 = scalar_lea.hbm %s2204_s6, %s1242_s10  ;;  %p1506_p1 = scmp.lt.s32.totalorder %s1504_s15, %s1498_s16 }
  0x1b   : > { %v645_v23 = vrot.slane %v250_v20, 2  ;;  %v646_v27 = vrot.slane %v1698_v22, 2  ;;  %v1716_v32 = vmax.f32 %v250_v20, 0.0  ;;  %v1719_v33 = vmax.f32 %v1698_v22, 0.0  ;;  %v271_v8 = vld [vmem:[%s2200_s2 + $0x78] sm:$0xff]  ;;  %1343 = vmatprep.subr.bf16.mxu1 %v1342_v62  ;;  %v631_v11 = vld [vmem:[%s2202_s4 + $0x30] sm:$0xff] }
  0x1c   : > { %v1739_v43 = vmax.f32 %v1728_v37, 0.0  ;;  %v632_v12 = vld [vmem:[%s2202_s4 + $0x38] sm:$0xff]  ;;  %v1310_v13 = vpack.c.bf16 %v271_v8, %v269_v6  ;;  %v268_v14 = vld [vmem:[%s2200_s2 + $0x60] sm:$0xff]  ;;  %v270_v15 = vld [vmem:[%s2200_s2 + $0x70] sm:$0xff]  ;;  %v648_v39 = vrot.slane %v1728_v37, 2  ;;  %p1507_p2 = por %p1506_p1, %p1505_p0 }
  0x1d   : > { %v647_v30 = vsel %vm506_vm0, %v645_v23, %v646_v27  ;;  %1293 = vmatpush1.bf16.msra.mxu0 %v1292_v31  ;;  %v301_v41 = vrot.slane %v1716_v32, 1  ;;  %v302_v42 = vrot.slane %v1719_v33, 1  ;;  %v273_v16 = vld [vmem:[%s2200_s2 + $0x88] sm:$0xff]  ;;  %v275_v17 = vld [vmem:[%s2200_s2 + $0x98] sm:$0xff]  ;;  %v1350_v18 = vpack.c.bf16 %v632_v12, %v631_v11  ;;  %v633_v20 = vld [vmem:[%s2202_s4 + $0x40] sm:$0xff] }
  0x1e   : > { %1275 = vmatprep.mubr.msk.f32.mxu1 %vm306_vm1, %v647_v30  ;;  %1295 = vmatprep.subr.bf16.mxu0 %v1294_v34  ;;  %v304_v53 = vrot.slane %v1739_v43, 1  ;;  %v1312_v19 = vpack.c.bf16 %v270_v15, %v268_v14  ;;  %v634_v21 = vld [vmem:[%s2202_s4 + $0x48] sm:$0xff]  ;;  %v1314_v23 = vpack.c.bf16 %v275_v17, %v273_v16  ;;  %v272_v24 = vld [vmem:[%s2200_s2 + $0x80] sm:$0xff]  ;;  %v274_v25 = vld [vmem:[%s2200_s2 + $0x90] sm:$0xff]  ;;  %v649_v48 = vsel %vm506_vm0, %v646_v27, %v648_v39  ;;  %p1508_p3 = pnand %p1507_p2, %p1501_p13 }
  0x1f   : > { %v303_v49 = vsel %vm300_vm2, %v301_v41, %v302_v42  ;;  %1345 = vmatpush3.bf16.msra.mxu1 %v1342_v62  ;;  %v1170_v26 = vld [vmem:[%s2200_s2 + $0x148] sm:$0xff]  ;;  %v1172_v28 = vld [vmem:[%s2200_s2 + $0x158] sm:$0xff]  ;;  %v1354_v29 = vpack.c.bf16 %v634_v21, %v633_v20  ;;  %v1316_v30 = vpack.c.bf16 %v274_v25, %v272_v24  ;;  %v1169_v34 = vld [vmem:[%s2200_s2 + $0x140] sm:$0xff]  ;;  %v507_v14 = vrot.slane %v1716_v32, 2 }
  0x20   : > { %v305_v0 = vsel %vm300_vm2, %v302_v42, %v304_v53  ;;  %1347 = vmatprep.subr.bf16.mxu1 %v1346_v9  ;;  %v1318_v31 = vpack.c.bf16 %v1172_v28, %v1170_v26  ;;  %v1171_v35 = vld [vmem:[%s2200_s2 + $0x150] sm:$0xff]  ;;  %v1174_v36 = vld [vmem:[%s2200_s2 + $0x168] sm:$0xff]  ;;  %v1176_v38 = vld [vmem:[%s2200_s2 + $0x178] sm:$0xff]  ;;  %v508_v15 = vrot.slane %v1719_v33, 2  ;;  %v510_v20 = vrot.slane %v1739_v43, 2 }
  0x21   : > { %1297 = vmatpush1.bf16.msra.mxu0 %v1296_v40  ;;  %v1197_v40 = vld [vmem:[%s2201_s3 + $0x90] sm:$0xff]  ;;  %v1198_v41 = vld [vmem:[%s2201_s3 + $0x98] sm:$0xff]  ;;  %v1320_v42 = vpack.c.bf16 %v1171_v35, %v1169_v34  ;;  %v1173_v45 = vld [vmem:[%s2200_s2 + $0x160] sm:$0xff] }
  0x22   : > { %1299 = vmatprep.subr.bf16.mxu0 %v1298_v44  ;;  %v1322_v44 = vpack.c.bf16 %v1176_v38, %v1174_v36  ;;  %v1175_v37 = vld [vmem:[%s2200_s2 + $0x170] sm:$0xff]  ;;  %v1178_v46 = vld [vmem:[%s2200_s2 + $0x188] sm:$0xff]  ;;  %v1180_v47 = vld [vmem:[%s2200_s2 + $0x198] sm:$0xff] }
  0x23   : > { %1349 = vmatpush3.bf16.msra.mxu1 %v1346_v9  ;;  %v1199_v51 = vld [vmem:[%s2201_s3 + $0xa0] sm:$0xff]  ;;  %v1200_v52 = vld [vmem:[%s2201_s3 + $0xa8] sm:$0xff]  ;;  %v1326_v22 = vpack.c.bf16 %v1180_v47, %v1178_v46  ;;  %v1184_v56 = vld [vmem:[%s2200_s2 + $0x1b8] sm:$0xff] }
  0x24   : > { %1163 = vmatmul.mubr.msk.f32.vlgmr.msra.gmra.mrb[0].mxu0 %vm306_vm1, %v303_v49  ;;  %1351 = vmatprep.subr.bf16.mxu1 %v1350_v18  ;;  %v1386_v49 = vpack.c.bf16 %v1198_v41, %v1197_v40  ;;  %v1177_v27 = vld [vmem:[%s2200_s2 + $0x180] sm:$0xff]  ;;  %v1182_v55 = vld [vmem:[%s2200_s2 + $0x1a8] sm:$0xff]  ;;  %v1389_v57 = vpack.c.bf16 %v1200_v52, %v1199_v51  ;;  %v1201_v58 = vld [vmem:[%s2201_s3 + $0xb0] sm:$0xff] }
  0x25   : > { %1301 = vmatpush1.bf16.msra.mxu0 %v1300_v50  ;;  %383 = vmatprep.mubr.f32.mxu0 %v1562_v7  ;;  %v1563_v50 = vmov 0.0|0.0   ;;  %v1202_v59 = vld [vmem:[%s2201_s3 + $0xb8] sm:$0xff]  ;;  %v1330_v61 = vpack.c.bf16 %v1184_v56, %v1182_v55  ;;  %v1181_v62 = vld [vmem:[%s2200_s2 + $0x1a0] sm:$0xff]  ;;  %v1204_v4 = vld [vmem:[%s2201_s3 + $0xc8] sm:$0xff] }
  0x26   : > { %1303 = vmatprep.subr.bf16.mxu0 %v1302_v54  ;;  %v1179_v54 = vld [vmem:[%s2200_s2 + $0x190] sm:$0xff]  ;;  %v1188_v1 = vld [vmem:[%s2200_s2 + $0x1d8] sm:$0xff]  ;;  %v1392_v2 = vpack.c.bf16 %v1202_v59, %v1201_v58  ;;  %v1185_v8 = vld [vmem:[%s2200_s2 + $0x1c0] sm:$0xff] }
  0x27   : > { %1353 = vmatpush3.bf16.msra.mxu1 %v1350_v18  ;;  %v1328_v60 = vpack.c.bf16 %v1179_v54, %v1177_v27  ;;  %v1187_v9 = vld [vmem:[%s2200_s2 + $0x1d0] sm:$0xff]  ;;  %v1206_v12 = vld [vmem:[%s2201_s3 + $0xd8] sm:$0xff]  ;;  %v729_v16 = vld [vmem:[%s2201_s3] sm:$0xff] }
  0x28   : > { %1164 = vmatmul.mubr.msk.f32.gmra.mrb[2].mxu0 %vm306_vm1, %v305_v0  ;;  %1355 = vmatprep.subr.bf16.mxu1 %v1354_v29  ;;  %v1186_v0 = vld [vmem:[%s2200_s2 + $0x1c8] sm:$0xff]  ;;  %v1205_v11 = vld [vmem:[%s2201_s3 + $0xd0] sm:$0xff]  ;;  %v732_v24 = vld [vmem:[%s2201_s3 + $0x18] sm:$0xff] }
  0x29   : > { %1305 = vmatpush1.bf16.msra.mxu0 %v1304_v63  ;;  %389 = vmatprep.mubr.f32.mxu0 %v1562_v7  ;;  %v1183_v63 = vld [vmem:[%s2200_s2 + $0x1b0] sm:$0xff]  ;;  %v1334_v6 = vpack.c.bf16 %v1188_v1, %v1186_v0  ;;  %v730_v17 = vld [vmem:[%s2201_s3 + $0x8] sm:$0xff]  ;;  %v1398_v18 = vpack.c.bf16 %v1206_v12, %v1205_v11  ;;  %v733_v28 = vld [vmem:[%s2201_s3 + $0x20] sm:$0xff] }
  0x2a   : > { %1307 = vmatprep.subr.bf16.mxu0 %v1306_v3  ;;  %v1203_v3 = vld [vmem:[%s2201_s3 + $0xc0] sm:$0xff]  ;;  %v1332_v5 = vpack.c.bf16 %v1183_v63, %v1181_v62  ;;  %v1359_v21 = vpack.c.bf16 %v730_v17, %v729_v16  ;;  %v736_v34 = vld [vmem:[%s2201_s3 + $0x38] sm:$0xff]  ;;  %v738_v36 = vld [vmem:[%s2201_s3 + $0x48] sm:$0xff] }
  0x2b   : > { %1357 = vmatpush3.bf16.msra.mxu1 %v1354_v29  ;;  %v734_v29 = vld [vmem:[%s2201_s3 + $0x28] sm:$0xff]  ;;  %v739_v39 = vld [vmem:[%s2201_s3 + $0x50] sm:$0xff]  ;;  %v740_v40 = vld [vmem:[%s2201_s3 + $0x58] sm:$0xff] }
  0x2c   : > { %1165 = vmatmul.mubr.msk.f32.gmra.mrb[4].mxu0 %vm306_vm1, %v304_v53  ;;  %1385 = vmatprep.subr.bf16.mxu1 %v1563_v50  ;;  %v1324_v53 = vpack.c.bf16 %v1175_v37, %v1173_v45  ;;  %v1374_v41 = vpack.c.bf16 %v740_v40, %v739_v39  ;;  %v743_v37 = vld [vmem:[%s2201_s3 + $0x70] sm:$0xff]  ;;  %v744_v46 = vld [vmem:[%s2201_s3 + $0x78] sm:$0xff]  ;;  %v745_v52 = vld [vmem:[%s2201_s3 + $0x80] sm:$0xff] }
  0x2d   : > { %1309 = vmatpush1.bf16.msra.mxu0 %v1308_v10  ;;  %466 = vmatprep.mubr.f32.mxu0 %v1562_v7  ;;  %v1395_v10 = vpack.c.bf16 %v1204_v4, %v1203_v3  ;;  %v1380_v47 = vpack.c.bf16 %v744_v46, %v743_v37  ;;  %v1211_v27 = vld [vmem:[%s2201_s3 + $0x100] sm:$0xff]  ;;  %v1212_v54 = vld [vmem:[%s2201_s3 + $0x108] sm:$0xff]  ;;  %v1213_v56 = vld [vmem:[%s2201_s3 + $0x110] sm:$0xff] }
  0x2e   : > { %1311 = vmatprep.subr.bf16.mxu0 %v1310_v13  ;;  %1276 = vmatmul.mubr.msk.f32.vlgmr.msra.gmra.mrb[0].mxu1 %vm306_vm1, %v649_v48  ;;  %v1336_v13 = vpack.c.bf16 %v1187_v9, %v1185_v8  ;;  %v1209_v48 = vld [vmem:[%s2201_s3 + $0xf0] sm:$0xff]  ;;  %v1407_v55 = vpack.c.bf16 %v1212_v54, %v1211_v27  ;;  %v613_v63 = vld [vmem:[%s2199_s1] sm:$0xff]  ;;  %v614_v1 = vld [vmem:[%s2199_s1 + $0x8] sm:$0xff] }
  0x2f   : > { %1387 = vmatpush1.bf16.msra.mxu1 %v1386_v49  ;;  %v1210_v49 = vld [vmem:[%s2201_s3 + $0xf8] sm:$0xff]  ;;  %v1225_v54 = vld [vmem:[%s2201_s3 + $0x160] sm:$0xff] }
  0x30   : > { %1388 = vmatprep.subr.bf16.mxu1 %v1563_v50  ;;  %v1404_v51 = vpack.c.bf16 %v1210_v49, %v1209_v48  ;;  %v1221_v48 = vld [vmem:[%s2201_s3 + $0x140] sm:$0xff]  ;;  %v1222_v49 = vld [vmem:[%s2201_s3 + $0x148] sm:$0xff] }
  0x31   : > { %1313 = vmatpush1.bf16.msra.mxu0 %v1312_v19  ;;  %v1207_v19 = vld [vmem:[%s2201_s3 + $0xe0] sm:$0xff] }
  0x32   : > { %1315 = vmatprep.subr.bf16.mxu0 %v1314_v23  ;;  %v731_v23 = vld [vmem:[%s2201_s3 + $0x10] sm:$0xff] }
  0x33   : > { %1390 = vmatpush1.bf16.msra.mxu1 %v1389_v57  ;;  %v1362_v26 = vpack.c.bf16 %v732_v24, %v731_v23  ;;  %v1214_v57 = vld [vmem:[%s2201_s3 + $0x118] sm:$0xff] }
  0x34   : > { %1391 = vmatprep.subr.bf16.mxu1 %v1563_v50  ;;  %v1410_v58 = vpack.c.bf16 %v1214_v57, %v1213_v56  ;;  %v1227_v57 = vld [vmem:[%s2201_s3 + $0x170] sm:$0xff] }
  0x35   : > { %1317 = vmatpush1.bf16.msra.mxu0 %v1316_v30  ;;  %v1365_v30 = vpack.c.bf16 %v734_v29, %v733_v28 }
  0x36   : > { %1319 = vmatprep.subr.bf16.mxu0 %v1318_v31  ;;  %v735_v31 = vld [vmem:[%s2201_s3 + $0x30] sm:$0xff] }
  0x37   : > { %1393 = vmatpush1.bf16.msra.mxu1 %v1392_v2  ;;  %v1368_v35 = vpack.c.bf16 %v736_v34, %v735_v31 }
  0x38   : > { %1166 = vmatmul.mubr.msk.f32.vlgmr.msra.gmra.mrb[0].mxu0 %vm306_vm1, %v1716_v32  ;;  %1394 = vmatprep.subr.bf16.mxu1 %v1563_v50  ;;  %v1208_v32 = vld [vmem:[%s2201_s3 + $0xe8] sm:$0xff] }
  0x39   : > { %1321 = vmatpush1.bf16.msra.mxu0 %v1320_v42  ;;  %472 = vmatprep.mubr.f32.mxu0 %v1562_v7  ;;  %v1401_v25 = vpack.c.bf16 %v1208_v32, %v1207_v19  ;;  %v741_v42 = vld [vmem:[%s2201_s3 + $0x60] sm:$0xff]  ;;  %v1218_v32 = vld [vmem:[%s2201_s3 + $0x128] sm:$0xff] }
  0x3a   : > { %1323 = vmatprep.subr.bf16.mxu0 %v1322_v44  ;;  %v742_v44 = vld [vmem:[%s2201_s3 + $0x68] sm:$0xff]  ;;  %v1217_v19 = vld [vmem:[%s2201_s3 + $0x120] sm:$0xff] }
  0x3b   : > { %1396 = vmatpush1.bf16.msra.mxu1 %v1395_v10  ;;  %v1377_v45 = vpack.c.bf16 %v742_v44, %v741_v42  ;;  %v616_v10 = vld [vmem:[%s2199_s1 + $0x18] sm:$0xff]  ;;  %v1413_v31 = vpack.c.bf16 %v1218_v32, %v1217_v19 }
  0x3c   : > { %1167 = vmatmul.mubr.msk.f32.gmra.mrb[2].mxu0 %vm306_vm1, %v1719_v33  ;;  %1397 = vmatprep.subr.bf16.mxu1 %v1563_v50  ;;  %v509_v33 = vsel %vm506_vm0, %v507_v14, %v508_v15  ;;  %v618_v14 = vld [vmem:[%s2199_s1 + $0x28] sm:$0x3] }
  0x3d   : > { %1325 = vmatpush1.bf16.msra.mxu0 %v1324_v53  ;;  %478 = vmatprep.mubr.f32.mxu0 %v1562_v7  ;;  %v746_v53 = vld [vmem:[%s2201_s3 + $0x88] sm:$0xff] }
  0x3e   : > { %1327 = vmatprep.subr.bf16.mxu0 %v1326_v22  ;;  %v1383_v22 = vpack.c.bf16 %v746_v53, %v745_v52  ;;  %v1419_v52 = vpack.c.bf16 %v1222_v49, %v1221_v48  ;;  %v1223_v53 = vld [vmem:[%s2201_s3 + $0x150] sm:$0xff] }
  0x3f   : > { %1399 = vmatpush1.bf16.msra.mxu1 %v1398_v18 }
  0x40   : > { %1168 = vmatmul.mubr.msk.f32.gmra.mrb[4].mxu0 %vm306_vm1, %v1739_v43  ;;  %1400 = vmatprep.subr.bf16.mxu1 %v1563_v50  ;;  %v511_v43 = vsel %vm506_vm0, %v508_v15, %v510_v20 }
  0x41   : > { %1329 = vmatpush1.bf16.msra.mxu0 %v1328_v60  ;;  %582 = vmatprep.mubr.f32.mxu0 %v1562_v7 }
  0x42   : > { %1331 = vmatprep.subr.bf16.mxu0 %v1330_v61 }
  0x43   : > { %1402 = vmatpush1.bf16.msra.mxu1 %v1401_v25 }
  0x44   : > { %1403 = vmatprep.subr.bf16.mxu1 %v1563_v50 }
  0x45   : > { %1333 = vmatpush1.bf16.msra.mxu0 %v1332_v5 }
  0x46   : > { %1335 = vmatprep.subr.bf16.mxu0 %v1334_v6  ;;  %v615_v6 = vld [vmem:[%s2199_s1 + $0x10] sm:$0xff] }
  0x47   : > { %1405 = vmatpush1.bf16.msra.mxu1 %v1404_v51 }
  0x48   : > { %1406 = vmatprep.subr.bf16.mxu1 %v1563_v50 }
  0x49   : > { %1337 = vmatpush1.bf16.msra.mxu0 %v1336_v13  ;;  %v617_v13 = vld [vmem:[%s2199_s1 + $0x20] sm:$0x3] }
  0x4a   : > { %1358 = vmatprep.subr.bf16.mxu0 %v1563_v50 }
  0x4b   : > { %1408 = vmatpush1.bf16.msra.mxu1 %v1407_v55  ;;  %v1226_v55 = vld [vmem:[%s2201_s3 + $0x168] sm:$0xff] }
  0x4c   : > { %1189 = vmatmul.mubr.msk.f32.vlgmr.msra.gmra.mrb[0].mxu0 %vm306_vm1, %v509_v33  ;;  %1409 = vmatprep.subr.bf16.mxu1 %v1563_v50  ;;  %v1425_v56 = vpack.c.bf16 %v1226_v55, %v1225_v54 }
  0x4d   : > { %588 = vmatprep.mubr.f32.mxu0 %v1562_v7  ;;  %1360 = vmatpush1.bf16.msra.mxu0 %v1359_v21 }
  0x4e   : > { %1361 = vmatprep.subr.bf16.mxu0 %v1563_v50 }
  0x4f   : > { %1411 = vmatpush1.bf16.msra.mxu1 %v1410_v58  ;;  %v1228_v58 = vld [vmem:[%s2201_s3 + $0x178] sm:$0xff] }
  0x50   : > { %1190 = vmatmul.mubr.msk.f32.gmra.mrb[2].mxu0 %vm306_vm1, %v511_v43  ;;  %1412 = vmatprep.subr.bf16.mxu1 %v1563_v50 }
  0x51   : > { %594 = vmatprep.mubr.f32.mxu0 %v1562_v7  ;;  %1363 = vmatpush1.bf16.msra.mxu0 %v1362_v26  ;;  %v737_v7 = vld [vmem:[%s2201_s3 + $0x40] sm:$0xff] }
  0x52   : > { %1364 = vmatprep.subr.bf16.mxu0 %v1563_v50  ;;  %v1371_v38 = vpack.c.bf16 %v738_v36, %v737_v7  ;;  %v1219_v36 = vld [vmem:[%s2201_s3 + $0x130] sm:$0xff] }
  0x54   : > { %1191 = vmatmul.mubr.msk.f32.gmra.mrb[4].mxu0 %vm306_vm1, %v510_v20 }
  0x55   : > { %1366 = vmatpush1.bf16.msra.mxu0 %v1365_v30 }
  0x56   : > { %1367 = vmatprep.subr.bf16.mxu0 %v1563_v50 }
  0x59   : > { %1369 = vmatpush1.bf16.msra.mxu0 %v1368_v35 }
  0x5a   : > { %1370 = vmatprep.subr.bf16.mxu0 %v1563_v50 }
  0x5d   : > { %1372 = vmatpush1.bf16.msra.mxu0 %v1371_v38  ;;  %v1220_v38 = vld [vmem:[%s2201_s3 + $0x138] sm:$0xff] }
  0x5e   : > { %1373 = vmatprep.subr.bf16.mxu0 %v1563_v50  ;;  %v1416_v37 = vpack.c.bf16 %v1220_v38, %v1219_v36 }
  0x61   : > { %1375 = vmatpush1.bf16.msra.mxu0 %v1374_v41 }
  0x62   : > { %1376 = vmatprep.subr.bf16.mxu0 %v1563_v50 }
  0x65   : > { %1378 = vmatpush1.bf16.msra.mxu0 %v1377_v45 }
  0x66   : > { %1379 = vmatprep.subr.bf16.mxu0 %v1563_v50 }
  0x69   : > { %1381 = vmatpush1.bf16.msra.mxu0 %v1380_v47 }
  0x6a   : > { %1382 = vmatprep.subr.bf16.mxu0 %v1563_v50 }
  0x6d   : > { %1384 = vmatpush1.bf16.msra.mxu0 %v1383_v22  ;;  %v1224_v22 = vld [vmem:[%s2201_s3 + $0x158] sm:$0xff] }
  0x6e   : > { %v1422_v27 = vpack.c.bf16 %v1224_v22, %v1223_v53 }
 0x101   : > { %v2045_v59 = vpop.f32.mrb[0].mxu1 }
 0x102   : > { %v2047_v60 = vpop.f32.mrb[1].mxu1 }
 0x11f   : > { %v584_v61 = vpop.f32.mrb[0].mxu0 }
 0x120   : > { %v607_v62 = vmax.f32 %v584_v61, 0.0  ;;  %v586_v0 = vpop.f32.mrb[1].mxu0  ;;  %v1428_v61 = vpack.c.bf16 %v1228_v58, %v1227_v57 }
 0x121   : > { %v608_v2 = vmax.f32 %v586_v0, 0.0 }
 0x122   : > { %v619_v3 = vmul.f32 %v613_v63, %v607_v62  ;;  %v1229_v62 = vld [vmem:[%s2201_s3 + $0x180] sm:$0xff]  ;;  %v1230_v63 = vld [vmem:[%s2201_s3 + $0x188] sm:$0xff] }
 0x123   : > { %v620_v4 = vmul.f32 %v614_v1, %v608_v2  ;;  %v590_v5 = vpop.f32.mrb[2].mxu0  ;;  %v1431_v0 = vpack.c.bf16 %v1230_v63, %v1229_v62  ;;  %v1231_v1 = vld [vmem:[%s2201_s3 + $0x190] sm:$0xff]  ;;  %v1232_v2 = vld [vmem:[%s2201_s3 + $0x198] sm:$0xff] }
 0x124   : > { %v609_v8 = vmax.f32 %v590_v5, 0.0  ;;  %v592_v9 = vpop.f32.mrb[3].mxu0  ;;  %v854_v15 = vrot.slane %v619_v3, 1  ;;  %v966_v16 = vrot.slane %v619_v3, 2  ;;  %v1234_v5 = vld [vmem:[%s2201_s3 + $0x1a8] sm:$0xff] }
 0x125   : > { %v610_v11 = vmax.f32 %v592_v9, 0.0  ;;  %1195 = vmatprep.mubr.msk.f32.mxu0 %vm747_vm3, %v620_v4  ;;  %v857_v33 = vrot.slane %v620_v4, 1  ;;  %v969_v25 = vrot.slane %v620_v4, 2  ;;  %v1233_v4 = vld [vmem:[%s2201_s3 + $0x1a0] sm:$0xff] }
 0x126   : > { %v621_v12 = vmul.f32 %v615_v6, %v609_v8  ;;  %819 = vmatmul.mubr.f32.vlgmr.msra.gmra.mrb[6].mxu0 %v619_v3  ;;  %v1434_v3 = vpack.c.bf16 %v1232_v2, %v1231_v1  ;;  %v1437_v6 = vpack.c.bf16 %v1234_v5, %v1233_v4  ;;  %v1192_v8 = vld [vmem:[%s2203_s5] ss:$0 sm:$0xff] }
 0x127   : > { %v622_v17 = vmul.f32 %v616_v10, %v610_v11  ;;  %v596_v18 = vpop.f32.mrb[4].mxu0  ;;  %v721_v9 = vadd.f32 %v1192_v8, %v2047_v60 }
 0x128   : > { %v855_v20 = vrot.slane %v621_v12, 1  ;;  %v967_v21 = vrot.slane %v621_v12, 2  ;;  %v611_v23 = vmax.f32 %v596_v18, 0.0  ;;  %v598_v24 = vpop.f32.mrb[5].mxu0 }
 0x129   : > { %v858_v43 = vrot.slane %v622_v17, 1  ;;  %v970_v26 = vrot.slane %v622_v17, 2  ;;  %v612_v28 = vmax.f32 %v598_v24, 0.0  ;;  %1196 = vmatprep.mubr.msk.f32.mxu0 %vm747_vm3, %v622_v17 }
 0x12a   : > { %v623_v29 = vmul.f32 %v617_v13, %v611_v23  ;;  %824 = vmatmul.mubr.f32.gmra.mrb[8].mxu0 %v621_v12  ;;  %v856_v30 = vsel %vm300_vm2, %v854_v15, %v855_v20  ;;  %v968_v34 = vsel %vm506_vm0, %v966_v16, %v967_v21  ;;  %v726_v13 = vadd.f32 %v2045_v59, %v1192_v8 }
 0x12b   : > { %v624_v35 = vmul.f32 %v618_v14, %v612_v28  ;;  %v859_v7 = vsel %vm300_vm2, %v857_v33, %v858_v43  ;;  %v971_v39 = vsel %vm506_vm0, %v969_v25, %v970_v26 }
 0x12c   : > { %v860_v40 = vrot.slane %v623_v29, 1  ;;  %v972_v41 = vrot.slane %v623_v29, 2  ;;  %1215 = vmatprep.mubr.msk.f32.mxu1 %vm747_vm3, %v859_v7 }
 0x12d   : > { %v862_v42 = vrot.slane %v624_v35, 1  ;;  %v974_v44 = vrot.slane %v624_v35, 2  ;;  %935 = vmatmul.mubr.f32.vlgmr.msra.gmra.mrb[2].mxu1 %v856_v30 }
 0x12e   : > { %1414 = vmatpush1.bf16.msra.mxu1 %v1413_v31  ;;  %v861_v45 = vsel %vm300_vm2, %v855_v20, %v860_v40  ;;  %v973_v46 = vsel %vm506_vm0, %v967_v21, %v972_v41 }
 0x12f   : > { %v863_v47 = vsel %vm300_vm2, %v858_v43, %v862_v42  ;;  %1415 = vmatprep.subr.bf16.mxu1 %v1563_v50  ;;  %v975_v51 = vsel %vm506_vm0, %v970_v26, %v974_v44 }
 0x130   : > { %1216 = vmatprep.mubr.msk.f32.mxu1 %vm747_vm3, %v863_v47 }
 0x131   : > { %940 = vmatmul.mubr.f32.gmra.mrb[4].mxu1 %v861_v45 }
 0x132   : > { %1417 = vmatpush1.bf16.msra.mxu1 %v1416_v37  ;;  %1235 = vmatprep.mubr.msk.f32.mxu1 %vm747_vm3, %v971_v39 }
 0x133   : > { %1418 = vmatprep.subr.bf16.mxu1 %v1563_v50 }
 0x136   : > { %1420 = vmatpush1.bf16.msra.mxu1 %v1419_v52 }
 0x137   : > { %1421 = vmatprep.subr.bf16.mxu1 %v1563_v50 }
 0x13a   : > { %1423 = vmatpush1.bf16.msra.mxu1 %v1422_v27 }
 0x13b   : > { %1424 = vmatprep.subr.bf16.mxu1 %v1563_v50 }
 0x13e   : > { %1426 = vmatpush1.bf16.msra.mxu1 %v1425_v56 }
 0x13f   : > { %1427 = vmatprep.subr.bf16.mxu1 %v1563_v50 }
 0x142   : > { %1429 = vmatpush1.bf16.msra.mxu1 %v1428_v61 }
 0x143   : > { %1430 = vmatprep.subr.bf16.mxu1 %v1563_v50 }
 0x146   : > { %1432 = vmatpush1.bf16.msra.mxu1 %v1431_v0 }
 0x147   : > { %1433 = vmatprep.subr.bf16.mxu1 %v1563_v50 }
 0x14a   : > { %1435 = vmatpush1.bf16.msra.mxu1 %v1434_v3 }
 0x14b   : > { %1436 = vmatprep.subr.bf16.mxu1 %v1563_v50 }
 0x14e   : > { %1438 = vmatpush1.bf16.msra.mxu1 %v1437_v6 }
 0x151   : > { %1047 = vmatmul.mubr.f32.vlgmr.msra.gmra.mrb[2].mxu1 %v968_v34 }
 0x152   : > { %1236 = vmatprep.mubr.msk.f32.mxu1 %vm747_vm3, %v975_v51 }
 0x155   : > { %1052 = vmatmul.mubr.f32.gmra.mrb[6].mxu1 %v973_v46 }
 0x1f9   : > { %v820_v10 = vpop.f32.mrb[6].mxu0 }
 0x1fa   : > { %v829_v11 = vadd.f32 %v820_v10, %v721_v9  ;;  %v822_v12 = vpop.f32.mrb[7].mxu0 }
 0x1fd   : > { %v825_v14 = vpop.f32.mrb[8].mxu0 }
 0x1fe   : > { %v830_v50 = vadd.f32 %v825_v14, %v726_v13  ;;  %v827_v15 = vpop.f32.mrb[9].mxu0 }
 0x204   : > { %v941_v16 = vpop.f32.mrb[4].mxu1 }
 0x205   : > { %v946_v17 = vadd.f32 %v941_v16, %v830_v50  ;;  %v943_v18 = vpop.f32.mrb[5].mxu1 }
 0x224   : > { %v1048_v19 = vpop.f32.mrb[2].mxu1 }
 0x225   : > { %v1439_v32 = vadd.f32 %v1048_v19, %v829_v11  ;;  %v1050_v60 = vpop.f32.mrb[3].mxu1 }
 0x227   : > { %1059 = vst [vmem:[%s244_s29] sm:$0xff] %v1439_v32 }
 0x228   : > { %v1053_v59 = vpop.f32.mrb[6].mxu1 }
 0x229   : > { %v1058_v33 = vadd.f32 %v1053_v59, %v946_v17  ;;  %v1055_v20 = vpop.f32.mrb[7].mxu1 }
 0x22b   : > { %1060 = vst [vmem:[%s244_s29 + $0x8] sm:$0xff] %v1058_v33 }
 0x22c   : > { %1511 = shalt.err (!%p1508_p3)
}
 0x22d   : > { %s1512_s18 = scalar_lea.hbm %s2155_s11, 256  ;;  %s1516_s26 = scalar_lea.hbm %s2204_s6, 512 }
 0x22e   : > { %p1513_p4 = scmp.ne.s32.totalorder %s2155_s11, %s1512_s18  ;;  %p1517_p9 = scmp.lt.u32.totalorder %s2155_s11, %s2204_s6 }
 0x22f   : > { %p1518_p10 = scmp.lt.u32.totalorder %s1516_s26, %s1512_s18  ;;  %p1520_p12 = scmp.lt.u32.totalorder %s1512_s18, %s2155_s11 }
 0x230   : > { %p1514_p7 = pnand %p1513_p4, %p1640_p5 }
 0x231   : > { %p1519_p11 = por %p1518_p10, %p1517_p9 }
 0x232   : > { %p1515_p8 = pneg %p1514_p7 }
 0x233   : > { %p1521_p13 = por %p1520_p12, %p1519_p11 }
 0x235   : > { %p1522_p0 = pnand %p1521_p13, %p1515_p8 }
 0x237   : > { %1525 = shalt.err (!%p1522_p0)
}
 0x238   : > { %s1565_s10 = smov 128   ;;  %s1566_s12 = smov 8  }
 0x239   : > { %1455 = dma.vmem_to_hbm [thread:$0]  (%p1640_p5), %s2150_s9, 256, %s2155_s11, %s2157_s14, %s1565_s10, %s1565_s10, %s1566_s12  }
 0x23a PF: > { %p1461_p1 = scmp.ge.s32.totalorder %s1560_s24, 2  ;;  %s1090_s13 = sand.u32 1, %s1548_s21  }
 0x23b   : > { %s1091_s16 = scalar_lea.sflag [#allocation3], %s1090_s13 }
 0x23c   : > { %p1458_p2 = pnand %p1461_p1, %p1644_p6 }
 0x23e   : > { %1543 = dma.done.wait (!%p1458_p2), %s1091_s16, 256  }
 0x23f   : > { %1545 = vsyncadd (!%p1458_p2), %s1091_s16, 4294967040  ;;  %p16_p3 = scmp.ge.s32.totalorder %s1627_s27, 4   ;;  %s2207_s21 = smov %s1552_s22 }
 0x240   : > { %s2208_s22 = smov %s1556_s23  ;;  %s2209_s23 = smov %s1638_s30 }
 0x241   : > { %s2210_s24 = smov %s1627_s27  ;;  %18 = sbr.rel (!%p16_p3) target bundleno = 3 (0x3), region = 83 }
 0x248   :  { %1096 = vsyncpa [#allocation3], 1 }
 0x249   :  { %1098 = vsyncpa [#allocation3 + $0x1], 1 }

</bundles_post_ra>
